<compile_context>
chip_gen: v5e
topology: v5e:2x2
jax: 0.10.0
libtpu: 0.0.40
codegen_flags: <defaults>
</compile_context>

<pallas_src>
import jax
import jax.numpy as jnp
from jax.experimental import pallas as pl
from jax.experimental.pallas import tpu as pltpu


def _round_up(x, m):
    return (x + m - 1) // m * m


# ------------------------- fused Pallas kernel -----------------------------


def _make_ffnn_kernel(hidden_sizes):
    """Kernel body fusing all hidden layers + final Linear (static unroll).

    `hidden_sizes` are the REAL (unpadded) hidden widths: feature axes are
    zero-padded to 128-lane multiples, so LayerNorm statistics must divide by
    the real width, not the padded one.
    """
    inv_h = [1.0 / float(h) for h in hidden_sizes]

    def kernel(x_ref, *rest):
        *p, o_ref = rest
        h = x_ref[...].astype(jnp.bfloat16)  # MXU operand dtype
        idx = 0
        for li in range(len(hidden_sizes)):
            wa, wg, ba, bg, gamma, beta = p[idx:idx + 6]
            idx += 6
            # Two H-wide dots (no [B, 2H] lane slicing), f32 accumulation.
            a = jnp.dot(h, wa[...], preferred_element_type=jnp.float32) + ba[...]
            g = jnp.dot(h, wg[...], preferred_element_type=jnp.float32) + bg[...]
            # GLU(dim=1): value * sigmoid(gate).  Padded cols: 0 * 0.5 == 0.
            glu = a * jax.nn.sigmoid(g)
            # LayerNorm over the REAL feature width (zero-padded cols add 0 to
            # both sums), eps = 1e-5 (PyTorch default), f32 math.
            mean = jnp.sum(glu, axis=-1, keepdims=True) * inv_h[li]
            meansq = jnp.sum(glu * glu, axis=-1, keepdims=True) * inv_h[li]
            var = jnp.maximum(meansq - mean * mean, 0.0)
            normed = (glu - mean) * jax.lax.rsqrt(var + 1e-5)
            # gamma/beta are 0 in padded cols -> padded cols of h stay exactly 0.
            h = (normed * gamma[...] + beta[...]).astype(jnp.bfloat16)
        w, b = p[idx], p[idx + 1]
        # Final Linear into a lane-dense (128-multiple) output slab.
        o_ref[...] = jnp.dot(h, w[...], preferred_element_type=jnp.float32) + b[...]

    return kernel


# --------------------------- wrapper ----------------------------------------


def ffnn_forward(x, params, *, block_m=128):
    batch, in_features = x.shape
    hidden_layers = [l for l in params if l[0] == "hidden"]
    out_layer = params[-1]
    hidden_sizes = [l[1].shape[-1] for l in hidden_layers]
    output_size = out_layer[1].shape[-1]

    LANE = 128
    in_pad = _round_up(max(in_features, LANE), LANE)
    hid_pad = [_round_up(max(h, LANE), LANE) for h in hidden_sizes]
    out_pad = _round_up(max(output_size, LANE), LANE)

    # ---- batch (M) tiling: sublane-aligned tile, pad batch if needed -------
    tm = min(block_m, _round_up(batch, 8))
    padded_batch = _round_up(batch, tm)
    grid_m = padded_batch // tm

    # Lane-dense, zero-padded input slab.
    x_p = jnp.zeros((padded_batch, in_pad), jnp.float32)
    x_p = x_p.at[:batch, :in_features].set(x)

    # ---- operands: bf16 weights (MXU), f32 biases / LN params --------------
    flat_inputs = []
    in_specs = [pl.BlockSpec((tm, in_pad), lambda m: (m, 0))]

    def add_resident(arr):
        # Full-array block, constant block index along the batch grid axis:
        # DMA'd into VMEM once, not re-fetched per batch tile.
        flat_inputs.append(arr)
        in_specs.append(pl.BlockSpec(arr.shape, lambda m: (0, 0)))

    def pad2(arr, rows, cols, dtype):
        out = jnp.zeros((rows, cols), dtype)
        return out.at[: arr.shape[0], : arr.shape[1]].set(arr.astype(dtype))

    prev_pad = in_pad
    for (_, wa, wg, ba, bg, gamma, beta), hp in zip(hidden_layers, hid_pad):
        add_resident(pad2(wa, prev_pad, hp, jnp.bfloat16))
        add_resident(pad2(wg, prev_pad, hp, jnp.bfloat16))
        add_resident(pad2(ba, 1, hp, jnp.float32))
        add_resident(pad2(bg, 1, hp, jnp.float32))
        add_resident(pad2(gamma, 1, hp, jnp.float32))   # 0 in padded cols
        add_resident(pad2(beta, 1, hp, jnp.float32))    # 0 in padded cols
        prev_pad = hp

    _, w_out, b_out = out_layer
    add_resident(pad2(w_out, prev_pad, out_pad, jnp.bfloat16))
    add_resident(pad2(b_out, 1, out_pad, jnp.float32))

    out = pl.pallas_call(
        _make_ffnn_kernel(hidden_sizes),
        out_shape=jax.ShapeDtypeStruct((padded_batch, out_pad), jnp.float32),
        grid=(grid_m,),
        in_specs=in_specs,
        out_specs=pl.BlockSpec((tm, out_pad), lambda m: (m, 0)),
        compiler_params=pltpu.CompilerParams(
            dimension_semantics=("parallel",),      # shard batch tiles across TCs
            vmem_limit_bytes=48 * 1024 * 1024,      # above all scoped defaults,
        ),                                          # below v7x physical 64 MiB
    )(x_p, *flat_inputs)
    return out[:batch, :output_size]


# ----------------------- parameter construction ----------------------------


def init_params(key, input_size, hidden_sizes, output_size):
    """PyTorch-style init U(-1/sqrt(fan_in), 1/sqrt(fan_in)).

    The GLU Linear's weight/bias are stored split into value (a) and gate (g)
    halves, weights pre-transposed to [in, out] so the kernel does x @ W.
    """
    params = []
    prev = input_size
    for hs in hidden_sizes:
        key, kwa, kwg, kba, kbg = jax.random.split(key, 5)
        bound = 1.0 / float(prev) ** 0.5
        wa = jax.random.uniform(kwa, (prev, hs), jnp.float32, -bound, bound)
        wg = jax.random.uniform(kwg, (prev, hs), jnp.float32, -bound, bound)
        ba = jax.random.uniform(kba, (1, hs), jnp.float32, -bound, bound)
        bg = jax.random.uniform(kbg, (1, hs), jnp.float32, -bound, bound)
        gamma = jnp.ones((1, hs), jnp.float32)   # LayerNorm weight
        beta = jnp.zeros((1, hs), jnp.float32)   # LayerNorm bias
        params.append(("hidden", wa, wg, ba, bg, gamma, beta))
        prev = hs
    key, kw, kb = jax.random.split(key, 3)
    bound = 1.0 / float(prev) ** 0.5
    w = jax.random.uniform(kw, (prev, output_size), jnp.float32, -bound, bound)
    b = jax.random.uniform(kb, (1, output_size), jnp.float32, -bound, bound)
    params.append(("out", w, b))
    return params


# ----------------------------- reference ------------------------------------


def ffnn_forward_ref(x, params, *, mxu_dtype=jnp.float32):
    """Pure-JAX reference mirroring the PyTorch forward.

    mxu_dtype=bfloat16 mirrors the kernel's MXU operand precision (still f32
    accumulation / elementwise math); mxu_dtype=float32 is the exact PyTorch
    math.
    """
    h = x
    for layer in params:
        if layer[0] == "hidden":
            _, wa, wg, ba, bg, gamma, beta = layer
            hc = h.astype(mxu_dtype)
            a = jnp.dot(hc, wa.astype(mxu_dtype),
                        preferred_element_type=jnp.float32) + ba
            g = jnp.dot(hc, wg.astype(mxu_dtype),
                        preferred_element_type=jnp.float32) + bg
            glu = a * jax.nn.sigmoid(g)
            mean = jnp.mean(glu, axis=-1, keepdims=True)
            var = jnp.mean((glu - mean) ** 2, axis=-1, keepdims=True)
            h = (glu - mean) * jax.lax.rsqrt(var + 1e-5) * gamma + beta
        else:
            _, w, b = layer
            h = jnp.dot(h.astype(mxu_dtype), w.astype(mxu_dtype),
                        preferred_element_type=jnp.float32) + b
    return h


if __name__ == "__main__":
    batch = 20            # deliberately not a tile multiple -> exercises padding
    input_size = 16
    hidden_sizes = (32, 32)
    output_size = 8

    key = jax.random.PRNGKey(0)
    key, kx = jax.random.split(key)
    x = jax.random.normal(kx, (batch, input_size), jnp.float32)
    params = init_params(key, input_size, hidden_sizes, output_size)

    # block_m=8 at this tiny size so the batch grid has >1 tile (exercises the
    # pipelined grid + resident-weight index maps); default is 128.
    out = jax.block_until_ready(ffnn_forward(x, params, block_m=8))

    ref_bf16 = ffnn_forward_ref(x, params, mxu_dtype=jnp.bfloat16)  # kernel precision
    ref_f32 = ffnn_forward_ref(x, params, mxu_dtype=jnp.float32)    # exact math

    assert out.shape == (batch, output_size)
    assert jnp.allclose(out, ref_bf16, atol=5e-3, rtol=5e-3)
    assert jnp.allclose(out, ref_f32, atol=1e-1, rtol=1e-1)

    print("KERNEL_OK")
</pallas_src>

<mosaic_0001>
module attributes {stable_mosaic.version = 11 : i64} {
  func.func @kernel(%arg0: i32, %arg1: memref<8x128xf32, #tpu.memory_space<vmem>>, %arg2: memref<128x128xbf16, #tpu.memory_space<vmem>>, %arg3: memref<128x128xbf16, #tpu.memory_space<vmem>>, %arg4: memref<1x128xf32, #tpu.memory_space<vmem>>, %arg5: memref<1x128xf32, #tpu.memory_space<vmem>>, %arg6: memref<1x128xf32, #tpu.memory_space<vmem>>, %arg7: memref<1x128xf32, #tpu.memory_space<vmem>>, %arg8: memref<128x128xbf16, #tpu.memory_space<vmem>>, %arg9: memref<128x128xbf16, #tpu.memory_space<vmem>>, %arg10: memref<1x128xf32, #tpu.memory_space<vmem>>, %arg11: memref<1x128xf32, #tpu.memory_space<vmem>>, %arg12: memref<1x128xf32, #tpu.memory_space<vmem>>, %arg13: memref<1x128xf32, #tpu.memory_space<vmem>>, %arg14: memref<128x128xbf16, #tpu.memory_space<vmem>>, %arg15: memref<1x128xf32, #tpu.memory_space<vmem>>, %arg16: memref<8x128xf32, #tpu.memory_space<vmem>>) attributes {dimension_semantics = [#tpu.dimension_semantics<parallel>], iteration_bounds = array<i64: 3>, scalar_prefetch = 0 : i64, scratch_operands = 0 : i64, tpu.core_type = #tpu.core_type<tc>, window_params = [{transform_indices = @transform_0, window_bounds = array<i64: 8, 128>}, {pipeline_mode = #tpu.pipeline_mode<synchronous>, transform_indices = @transform_1, window_bounds = array<i64: 128, 128>}, {pipeline_mode = #tpu.pipeline_mode<synchronous>, transform_indices = @transform_2, window_bounds = array<i64: 128, 128>}, {pipeline_mode = #tpu.pipeline_mode<synchronous>, transform_indices = @transform_3, window_bounds = array<i64: 1, 128>}, {pipeline_mode = #tpu.pipeline_mode<synchronous>, transform_indices = @transform_4, window_bounds = array<i64: 1, 128>}, {pipeline_mode = #tpu.pipeline_mode<synchronous>, transform_indices = @transform_5, window_bounds = array<i64: 1, 128>}, {pipeline_mode = #tpu.pipeline_mode<synchronous>, transform_indices = @transform_6, window_bounds = array<i64: 1, 128>}, {pipeline_mode = #tpu.pipeline_mode<synchronous>, transform_indices = @transform_7, window_bounds = array<i64: 128, 128>}, {pipeline_mode = #tpu.pipeline_mode<synchronous>, transform_indices = @transform_8, window_bounds = array<i64: 128, 128>}, {pipeline_mode = #tpu.pipeline_mode<synchronous>, transform_indices = @transform_9, window_bounds = array<i64: 1, 128>}, {pipeline_mode = #tpu.pipeline_mode<synchronous>, transform_indices = @transform_10, window_bounds = array<i64: 1, 128>}, {pipeline_mode = #tpu.pipeline_mode<synchronous>, transform_indices = @transform_11, window_bounds = array<i64: 1, 128>}, {pipeline_mode = #tpu.pipeline_mode<synchronous>, transform_indices = @transform_12, window_bounds = array<i64: 1, 128>}, {pipeline_mode = #tpu.pipeline_mode<synchronous>, transform_indices = @transform_13, window_bounds = array<i64: 128, 128>}, {pipeline_mode = #tpu.pipeline_mode<synchronous>, transform_indices = @transform_14, window_bounds = array<i64: 1, 128>}, {transform_indices = @transform_15, window_bounds = array<i64: 8, 128>}]} {
    %c0 = arith.constant 0 : index
    %c0_0 = arith.constant 0 : index
    %0 = vector.load %arg1[%c0, %c0_0] : memref<8x128xf32, #tpu.memory_space<vmem>>, vector<8x128xf32>
    %1 = arith.truncf %0 : vector<8x128xf32> to vector<8x128xbf16>
    %c0_1 = arith.constant 0 : index
    %c0_2 = arith.constant 0 : index
    %2 = vector.load %arg2[%c0_1, %c0_2] : memref<128x128xbf16, #tpu.memory_space<vmem>>, vector<128x128xbf16>
    %cst = arith.constant dense<0.000000e+00> : vector<8x128xf32>
    %3 = tpu.matmul %1, %2, %cst {dimension_numbers = #tpu.dot_dimension_numbers<[1], [0], [0], [1], [0, 0, 1, 1], [], []>} : vector<8x128xbf16>, vector<128x128xbf16>, vector<8x128xf32> -> vector<8x128xf32>
    %c0_3 = arith.constant 0 : index
    %c0_4 = arith.constant 0 : index
    %4 = vector.load %arg4[%c0_3, %c0_4] : memref<1x128xf32, #tpu.memory_space<vmem>>, vector<1x128xf32>
    %5 = vector.broadcast %4 : vector<1x128xf32> to vector<8x128xf32>
    %6 = arith.addf %3, %5 : vector<8x128xf32>
    %c0_5 = arith.constant 0 : index
    %c0_6 = arith.constant 0 : index
    %7 = vector.load %arg3[%c0_5, %c0_6] : memref<128x128xbf16, #tpu.memory_space<vmem>>, vector<128x128xbf16>
    %cst_7 = arith.constant dense<0.000000e+00> : vector<8x128xf32>
    %8 = tpu.matmul %1, %7, %cst_7 {dimension_numbers = #tpu.dot_dimension_numbers<[1], [0], [0], [1], [0, 0, 1, 1], [], []>} : vector<8x128xbf16>, vector<128x128xbf16>, vector<8x128xf32> -> vector<8x128xf32>
    %c0_8 = arith.constant 0 : index
    %c0_9 = arith.constant 0 : index
    %9 = vector.load %arg5[%c0_8, %c0_9] : memref<1x128xf32, #tpu.memory_space<vmem>>, vector<1x128xf32>
    %10 = vector.broadcast %9 : vector<1x128xf32> to vector<8x128xf32>
    %11 = arith.addf %8, %10 : vector<8x128xf32>
    %12 = arith.negf %11 : vector<8x128xf32>
    %13 = math.exp %12 : vector<8x128xf32>
    %cst_10 = arith.constant 1.000000e+00 : f32
    %14 = vector.broadcast %cst_10 : f32 to vector<8x128xf32>
    %15 = arith.addf %14, %13 : vector<8x128xf32>
    %16 = arith.divf %14, %15 : vector<8x128xf32>
    %17 = arith.mulf %6, %16 : vector<8x128xf32>
    %cst_11 = arith.constant dense<0.000000e+00> : vector<8xf32>
    %18 = vector.multi_reduction <add>, %17, %cst_11 [1] : vector<8x128xf32> to vector<8xf32>
    %19 = vector.shape_cast %18 : vector<8xf32> to vector<8x1xf32>
    %cst_12 = arith.constant 3.125000e-02 : f32
    %20 = vector.broadcast %cst_12 : f32 to vector<8x1xf32>
    %21 = arith.mulf %19, %20 : vector<8x1xf32>
    %22 = arith.mulf %17, %17 : vector<8x128xf32>
    %cst_13 = arith.constant dense<0.000000e+00> : vector<8xf32>
    %23 = vector.multi_reduction <add>, %22, %cst_13 [1] : vector<8x128xf32> to vector<8xf32>
    %24 = vector.shape_cast %23 : vector<8xf32> to vector<8x1xf32>
    %cst_14 = arith.constant 3.125000e-02 : f32
    %25 = vector.broadcast %cst_14 : f32 to vector<8x1xf32>
    %26 = arith.mulf %24, %25 : vector<8x1xf32>
    %27 = arith.mulf %21, %21 : vector<8x1xf32>
    %28 = arith.subf %26, %27 : vector<8x1xf32>
    %cst_15 = arith.constant 0.000000e+00 : f32
    %29 = vector.broadcast %cst_15 : f32 to vector<8x1xf32>
    %30 = arith.maximumf %28, %29 : vector<8x1xf32>
    %31 = vector.broadcast %21 : vector<8x1xf32> to vector<8x128xf32>
    %32 = arith.subf %17, %31 : vector<8x128xf32>
    %cst_16 = arith.constant 9.99999974E-6 : f32
    %33 = vector.broadcast %cst_16 : f32 to vector<8x1xf32>
    %34 = arith.addf %30, %33 : vector<8x1xf32>
    %35 = math.rsqrt %34 : vector<8x1xf32>
    %36 = vector.broadcast %35 : vector<8x1xf32> to vector<8x128xf32>
    %37 = arith.mulf %32, %36 : vector<8x128xf32>
    %c0_17 = arith.constant 0 : index
    %c0_18 = arith.constant 0 : index
    %38 = vector.load %arg6[%c0_17, %c0_18] : memref<1x128xf32, #tpu.memory_space<vmem>>, vector<1x128xf32>
    %39 = vector.broadcast %38 : vector<1x128xf32> to vector<8x128xf32>
    %40 = arith.mulf %37, %39 : vector<8x128xf32>
    %c0_19 = arith.constant 0 : index
    %c0_20 = arith.constant 0 : index
    %41 = vector.load %arg7[%c0_19, %c0_20] : memref<1x128xf32, #tpu.memory_space<vmem>>, vector<1x128xf32>
    %42 = vector.broadcast %41 : vector<1x128xf32> to vector<8x128xf32>
    %43 = arith.addf %40, %42 : vector<8x128xf32>
    %44 = arith.truncf %43 : vector<8x128xf32> to vector<8x128xbf16>
    %c0_21 = arith.constant 0 : index
    %c0_22 = arith.constant 0 : index
    %45 = vector.load %arg8[%c0_21, %c0_22] : memref<128x128xbf16, #tpu.memory_space<vmem>>, vector<128x128xbf16>
    %cst_23 = arith.constant dense<0.000000e+00> : vector<8x128xf32>
    %46 = tpu.matmul %44, %45, %cst_23 {dimension_numbers = #tpu.dot_dimension_numbers<[1], [0], [0], [1], [0, 0, 1, 1], [], []>} : vector<8x128xbf16>, vector<128x128xbf16>, vector<8x128xf32> -> vector<8x128xf32>
    %c0_24 = arith.constant 0 : index
    %c0_25 = arith.constant 0 : index
    %47 = vector.load %arg10[%c0_24, %c0_25] : memref<1x128xf32, #tpu.memory_space<vmem>>, vector<1x128xf32>
    %48 = vector.broadcast %47 : vector<1x128xf32> to vector<8x128xf32>
    %49 = arith.addf %46, %48 : vector<8x128xf32>
    %c0_26 = arith.constant 0 : index
    %c0_27 = arith.constant 0 : index
    %50 = vector.load %arg9[%c0_26, %c0_27] : memref<128x128xbf16, #tpu.memory_space<vmem>>, vector<128x128xbf16>
    %cst_28 = arith.constant dense<0.000000e+00> : vector<8x128xf32>
    %51 = tpu.matmul %44, %50, %cst_28 {dimension_numbers = #tpu.dot_dimension_numbers<[1], [0], [0], [1], [0, 0, 1, 1], [], []>} : vector<8x128xbf16>, vector<128x128xbf16>, vector<8x128xf32> -> vector<8x128xf32>
    %c0_29 = arith.constant 0 : index
    %c0_30 = arith.constant 0 : index
    %52 = vector.load %arg11[%c0_29, %c0_30] : memref<1x128xf32, #tpu.memory_space<vmem>>, vector<1x128xf32>
    %53 = vector.broadcast %52 : vector<1x128xf32> to vector<8x128xf32>
    %54 = arith.addf %51, %53 : vector<8x128xf32>
    %55 = arith.negf %54 : vector<8x128xf32>
    %56 = math.exp %55 : vector<8x128xf32>
    %cst_31 = arith.constant 1.000000e+00 : f32
    %57 = vector.broadcast %cst_31 : f32 to vector<8x128xf32>
    %58 = arith.addf %57, %56 : vector<8x128xf32>
    %59 = arith.divf %57, %58 : vector<8x128xf32>
    %60 = arith.mulf %49, %59 : vector<8x128xf32>
    %cst_32 = arith.constant dense<0.000000e+00> : vector<8xf32>
    %61 = vector.multi_reduction <add>, %60, %cst_32 [1] : vector<8x128xf32> to vector<8xf32>
    %62 = vector.shape_cast %61 : vector<8xf32> to vector<8x1xf32>
    %cst_33 = arith.constant 3.125000e-02 : f32
    %63 = vector.broadcast %cst_33 : f32 to vector<8x1xf32>
    %64 = arith.mulf %62, %63 : vector<8x1xf32>
    %65 = arith.mulf %60, %60 : vector<8x128xf32>
    %cst_34 = arith.constant dense<0.000000e+00> : vector<8xf32>
    %66 = vector.multi_reduction <add>, %65, %cst_34 [1] : vector<8x128xf32> to vector<8xf32>
    %67 = vector.shape_cast %66 : vector<8xf32> to vector<8x1xf32>
    %cst_35 = arith.constant 3.125000e-02 : f32
    %68 = vector.broadcast %cst_35 : f32 to vector<8x1xf32>
    %69 = arith.mulf %67, %68 : vector<8x1xf32>
    %70 = arith.mulf %64, %64 : vector<8x1xf32>
    %71 = arith.subf %69, %70 : vector<8x1xf32>
    %cst_36 = arith.constant 0.000000e+00 : f32
    %72 = vector.broadcast %cst_36 : f32 to vector<8x1xf32>
    %73 = arith.maximumf %71, %72 : vector<8x1xf32>
    %74 = vector.broadcast %64 : vector<8x1xf32> to vector<8x128xf32>
    %75 = arith.subf %60, %74 : vector<8x128xf32>
    %cst_37 = arith.constant 9.99999974E-6 : f32
    %76 = vector.broadcast %cst_37 : f32 to vector<8x1xf32>
    %77 = arith.addf %73, %76 : vector<8x1xf32>
    %78 = math.rsqrt %77 : vector<8x1xf32>
    %79 = vector.broadcast %78 : vector<8x1xf32> to vector<8x128xf32>
    %80 = arith.mulf %75, %79 : vector<8x128xf32>
    %c0_38 = arith.constant 0 : index
    %c0_39 = arith.constant 0 : index
    %81 = vector.load %arg12[%c0_38, %c0_39] : memref<1x128xf32, #tpu.memory_space<vmem>>, vector<1x128xf32>
    %82 = vector.broadcast %81 : vector<1x128xf32> to vector<8x128xf32>
    %83 = arith.mulf %80, %82 : vector<8x128xf32>
    %c0_40 = arith.constant 0 : index
    %c0_41 = arith.constant 0 : index
    %84 = vector.load %arg13[%c0_40, %c0_41] : memref<1x128xf32, #tpu.memory_space<vmem>>, vector<1x128xf32>
    %85 = vector.broadcast %84 : vector<1x128xf32> to vector<8x128xf32>
    %86 = arith.addf %83, %85 : vector<8x128xf32>
    %87 = arith.truncf %86 : vector<8x128xf32> to vector<8x128xbf16>
    %c0_42 = arith.constant 0 : index
    %c0_43 = arith.constant 0 : index
    %88 = vector.load %arg14[%c0_42, %c0_43] : memref<128x128xbf16, #tpu.memory_space<vmem>>, vector<128x128xbf16>
    %cst_44 = arith.constant dense<0.000000e+00> : vector<8x128xf32>
    %89 = tpu.matmul %87, %88, %cst_44 {dimension_numbers = #tpu.dot_dimension_numbers<[1], [0], [0], [1], [0, 0, 1, 1], [], []>} : vector<8x128xbf16>, vector<128x128xbf16>, vector<8x128xf32> -> vector<8x128xf32>
    %c0_45 = arith.constant 0 : index
    %c0_46 = arith.constant 0 : index
    %90 = vector.load %arg15[%c0_45, %c0_46] : memref<1x128xf32, #tpu.memory_space<vmem>>, vector<1x128xf32>
    %91 = vector.broadcast %90 : vector<1x128xf32> to vector<8x128xf32>
    %92 = arith.addf %89, %91 : vector<8x128xf32>
    %c0_47 = arith.constant 0 : index
    %c0_48 = arith.constant 0 : index
    %93 = vector.load %arg16[%c0_47, %c0_48] : memref<8x128xf32, #tpu.memory_space<vmem>>, vector<8x128xf32>
    tpu.vector_store %arg16[%c0_47, %c0_48], %92 {strides = array<i32>} : memref<8x128xf32, #tpu.memory_space<vmem>>, vector<8x128xf32>,
    return
  }
  func.func @transform_0(%arg0: i32) -> (i32, i32) {
    %c0_i32 = arith.constant 0 : i32
    %c0_i32_0 = arith.constant 0 : i32
    return %arg0, %c0_i32 : i32, i32
  }
  func.func @transform_1(%arg0: i32) -> (i32, i32) {
    %c0_i32 = arith.constant 0 : i32
    %c0_i32_0 = arith.constant 0 : i32
    %c0_i32_1 = arith.constant 0 : i32
    return %c0_i32, %c0_i32_0 : i32, i32
  }
  func.func @transform_2(%arg0: i32) -> (i32, i32) {
    %c0_i32 = arith.constant 0 : i32
    %c0_i32_0 = arith.constant 0 : i32
    %c0_i32_1 = arith.constant 0 : i32
    return %c0_i32, %c0_i32_0 : i32, i32
  }
  func.func @transform_3(%arg0: i32) -> (i32, i32) {
    %c0_i32 = arith.constant 0 : i32
    %c0_i32_0 = arith.constant 0 : i32
    %c0_i32_1 = arith.constant 0 : i32
    return %c0_i32, %c0_i32_0 : i32, i32
  }
  func.func @transform_4(%arg0: i32) -> (i32, i32) {
    %c0_i32 = arith.constant 0 : i32
    %c0_i32_0 = arith.constant 0 : i32
    %c0_i32_1 = arith.constant 0 : i32
    return %c0_i32, %c0_i32_0 : i32, i32
  }
  func.func @transform_5(%arg0: i32) -> (i32, i32) {
    %c0_i32 = arith.constant 0 : i32
    %c0_i32_0 = arith.constant 0 : i32
    %c0_i32_1 = arith.constant 0 : i32
    return %c0_i32, %c0_i32_0 : i32, i32
  }
  func.func @transform_6(%arg0: i32) -> (i32, i32) {
    %c0_i32 = arith.constant 0 : i32
    %c0_i32_0 = arith.constant 0 : i32
    %c0_i32_1 = arith.constant 0 : i32
    return %c0_i32, %c0_i32_0 : i32, i32
  }
  func.func @transform_7(%arg0: i32) -> (i32, i32) {
    %c0_i32 = arith.constant 0 : i32
    %c0_i32_0 = arith.constant 0 : i32
    %c0_i32_1 = arith.constant 0 : i32
    return %c0_i32, %c0_i32_0 : i32, i32
  }
  func.func @transform_8(%arg0: i32) -> (i32, i32) {
    %c0_i32 = arith.constant 0 : i32
    %c0_i32_0 = arith.constant 0 : i32
    %c0_i32_1 = arith.constant 0 : i32
    return %c0_i32, %c0_i32_0 : i32, i32
  }
  func.func @transform_9(%arg0: i32) -> (i32, i32) {
    %c0_i32 = arith.constant 0 : i32
    %c0_i32_0 = arith.constant 0 : i32
    %c0_i32_1 = arith.constant 0 : i32
    return %c0_i32, %c0_i32_0 : i32, i32
  }
  func.func @transform_10(%arg0: i32) -> (i32, i32) {
    %c0_i32 = arith.constant 0 : i32
    %c0_i32_0 = arith.constant 0 : i32
    %c0_i32_1 = arith.constant 0 : i32
    return %c0_i32, %c0_i32_0 : i32, i32
  }
  func.func @transform_11(%arg0: i32) -> (i32, i32) {
    %c0_i32 = arith.constant 0 : i32
    %c0_i32_0 = arith.constant 0 : i32
    %c0_i32_1 = arith.constant 0 : i32
    return %c0_i32, %c0_i32_0 : i32, i32
  }
  func.func @transform_12(%arg0: i32) -> (i32, i32) {
    %c0_i32 = arith.constant 0 : i32
    %c0_i32_0 = arith.constant 0 : i32
    %c0_i32_1 = arith.constant 0 : i32
    return %c0_i32, %c0_i32_0 : i32, i32
  }
  func.func @transform_13(%arg0: i32) -> (i32, i32) {
    %c0_i32 = arith.constant 0 : i32
    %c0_i32_0 = arith.constant 0 : i32
    %c0_i32_1 = arith.constant 0 : i32
    return %c0_i32, %c0_i32_0 : i32, i32
  }
  func.func @transform_14(%arg0: i32) -> (i32, i32) {
    %c0_i32 = arith.constant 0 : i32
    %c0_i32_0 = arith.constant 0 : i32
    %c0_i32_1 = arith.constant 0 : i32
    return %c0_i32, %c0_i32_0 : i32, i32
  }
  func.func @transform_15(%arg0: i32) -> (i32, i32) {
    %c0_i32 = arith.constant 0 : i32
    %c0_i32_0 = arith.constant 0 : i32
    return %arg0, %c0_i32 : i32, i32
  }
}

</mosaic_0001>

<bundles_post_ra>
// kernel: tpu_custom_call.1
= control target key start
LH: loop header
LB: loop body
LE: loop exit
PB: predicated region body
PF: predicated region fallthrough
CT: control target
= control target key end

     0   :  { %s2138_s0 = inlined_call_operand.hbm [shape: f32[24,128], index: 0, kind: input, shape index: {}]   ;;  %s2139_s1 = inlined_call_operand.hbm [shape: bf16[128,128], index: 1, kind: input, shape index: {}]   ;;  %s2140_s2 = inlined_call_operand.hbm [shape: bf16[128,128], index: 2, kind: input, shape index: {}]   ;;  %s2141_s3 = inlined_call_operand.vmem [shape: f32[1,128], index: 3, kind: input, shape index: {}]   ;;  %s2142_s4 = inlined_call_operand.vmem [shape: f32[1,128], index: 4, kind: input, shape index: {}]   ;;  %s2143_s5 = inlined_call_operand.vmem [shape: f32[1,128], index: 5, kind: input, shape index: {}]   ;;  %s2144_s6 = inlined_call_operand.vmem [shape: f32[1,128], index: 6, kind: input, shape index: {}]   ;;  %s2145_s7 = inlined_call_operand.hbm [shape: bf16[128,128], index: 7, kind: input, shape index: {}]   ;;  %s2146_s8 = inlined_call_operand.hbm [shape: bf16[128,128], index: 8, kind: input, shape index: {}]   ;;  %s2147_s9 = inlined_call_operand.vmem [shape: f32[1,128], index: 9, kind: input, shape index: {}]   ;;  %s2148_s10 = inlined_call_operand.vmem [shape: f32[1,128], index: 10, kind: input, shape index: {}]   ;;  %s2149_s11 = inlined_call_operand.vmem [shape: f32[1,128], index: 11, kind: input, shape index: {}]   ;;  %s2150_s12 = inlined_call_operand.vmem [shape: f32[1,128], index: 12, kind: input, shape index: {}]   ;;  %s2151_s13 = inlined_call_operand.hbm [shape: bf16[128,128], index: 13, kind: input, shape index: {}]   ;;  %s2152_s14 = inlined_call_operand.vmem [shape: f32[1,128], index: 14, kind: input, shape index: {}]   ;;  %s2153_s15 = inlined_call_operand.hbm [shape: f32[24,128], index: 15, kind: output, shape index: {}]  }
   0x1   :  { %2155 = sst [smem:[#allocation19_spill]] %s2139_s1 }
   0x2   :  { %2156 = sst [smem:[#allocation20_spill]] %s2140_s2 }
   0x3   :  { %2157 = sst [smem:[#allocation21_spill]] %s2145_s7 }
   0x4   :  { %2158 = sst [smem:[#allocation22_spill]] %s2146_s8 }
   0x5   :  { %2159 = sst [smem:[#allocation23_spill]] %s2149_s11 }
   0x6   :  { %2160 = sst [smem:[#allocation24_spill]] %s2150_s12 }
   0x7   :  { %2161 = sst [smem:[#allocation25_spill]] %s2151_s13 }
   0x8   :  { %2162 = sst [smem:[#allocation26_spill]] %s2152_s14 }
   0x9   :  { %2163 = sst [smem:[#allocation27_spill]] %s2153_s15 }
   0xa   :  { %20 = vsyncpa [#allocation3], 0 }
   0xb   :  { %22 = vsyncpa [#allocation3 + $0x1], 0 }
   0xc   :  { %23 = vsyncpa [#allocation6], 0 }
   0xd   :  { %24 = vsyncpa [#allocation9], 0 }
   0xe   :  { %25 = vsyncpa [#allocation12], 0 }
   0xf   :  { %26 = vsyncpa [#allocation4], 0 }
  0x10   :  { %28 = vsyncpa [#allocation4 + $0x1], 0  ;;  %s1936_s18 = smov 0   ;;  %s1938_s19 = smov 0  }
  0x11   :  { %s1940_s20 = smov 0   ;;  %s1942_s21 = smov 0  }
  0x12 LB: > { %s2164_s1 = sld [smem:[#allocation19_spill]]  ;;  %s1960_s25 = sadd.s32 4294967295, %s1847_s21   ;;  %s1847_s21 = sphi %s1942_s21, %s2182_s21   ;;  %s1843_s20 = sphi %s1940_s20, %s2181_s20   ;;  %s1839_s19 = sphi %s1938_s19, %s2180_s19   ;;  %s1835_s18 = sphi %s1936_s18, %s2179_s18  }
  0x13   : > { %p1246_p0 = scmp.ge.s32.totalorder %s1847_s21, 1  ;;  %p55_p1 = scmp.eq.s32.totalorder %s1960_s25, 0 }
  0x14   : > { %p385_p2 = scmp.lt.s32.totalorder %s1847_s21, 4  ;;  %s1849_s27 = smov [#allocation5]  }
  0x15   : > { %s398_s28 = sshll.u32 %s1849_s27, 4  ;;  %s2166_s7 = sld [smem:[#allocation21_spill]]  ;;  %s399_s28 = int_to_ptr.vmem [resolvable:$true] %s398_s28 }
  0x16   : > { %p1965_p3 = pnand %p1246_p0, %p385_p2  ;;  %s2168_s2 = sld [smem:[#allocation20_spill]] }
  0x17   : > { %s1851_s15 = smov 64   ;;  %s1852_s12 = smov 4  }
  0x18   : > { %s396_s24 = sshll.u32 %s2164_s1, 4  ;;  %p1493_p4 = pneg %p1965_p3  ;;  %s397_s24 = int_to_ptr.hbm [resolvable:$true] %s396_s24 }
  0x19   : > { %s1850_s1 = smov [#allocation8]   ;;  %s2169_s8 = sld [smem:[#allocation22_spill]] }
  0x1a   : > { %p1976_p5 = pnand %p1493_p4, %p55_p1  ;;  %s438_s14 = sshll.u32 %s1850_s1, 4  ;;  %s439_s14 = int_to_ptr.vmem [resolvable:$true] %s438_s14 }
  0x1b   : > { %s436_s16 = sshll.u32 %s2166_s7, 4  ;;  %s1853_s11 = smov [#allocation7]   ;;  %s437_s16 = int_to_ptr.hbm [resolvable:$true] %s436_s16 }
  0x1c   : > { %s410_s27 = sshll.u32 %s2168_s2, 4  ;;  %s412_s22 = sshll.u32 %s1853_s11, 4  ;;  %s411_s27 = int_to_ptr.hbm [resolvable:$true] %s410_s27  ;;  %s413_s22 = int_to_ptr.vmem [resolvable:$true] %s412_s22 }
  0x1d   : > { %1496 = dma.hbm_to_vmem [thread:$0]  (!%p1976_p5), %s397_s24, 1024, %s399_s28, [#allocation6], %s1851_s15, %s1851_s15, %s1852_s12  }
  0x1e   : > { %1502 = dma.hbm_to_vmem [thread:$0]  (!%p1976_p5), %s437_s16, 1024, %s439_s14, [#allocation9], %s1851_s15, %s1851_s15, %s1852_s12  }
  0x1f   : > { %s450_s7 = sshll.u32 %s2169_s8, 4  ;;  %s1854_s1 = smov [#allocation10]   ;;  %s451_s7 = int_to_ptr.hbm [resolvable:$true] %s450_s7 }
  0x20   : > { %1499 = dma.hbm_to_vmem [thread:$0]  (!%p1976_p5), %s411_s27, 1024, %s413_s22, [#allocation6], %s1851_s15, %s1851_s15, %s1852_s12  }
  0x21   : > { %s452_s14 = sshll.u32 %s1854_s1, 4  ;;  %s2170_s13 = sld [smem:[#allocation25_spill]]  ;;  %s453_s14 = int_to_ptr.vmem [resolvable:$true] %s452_s14 }
  0x22   : > { %1505 = dma.hbm_to_vmem [thread:$0]  (!%p1976_p5), %s451_s7, 1024, %s453_s14, [#allocation9], %s1851_s15, %s1851_s15, %s1852_s12  }
  0x23   : > { %s1855_s11 = smov [#allocation11]   ;;  %s1245_s27 = sadd.s32 4294967294, %s1847_s21  }
  0x24   : > { %s478_s23 = sshll.u32 %s1855_s11, 4  ;;  %s2001_s29 = sadd.s32 1, %s1847_s21   ;;  %s479_s23 = int_to_ptr.vmem [resolvable:$true] %s478_s23 }
  0x25   : > { %s41_s30 = sadd.s32 1, %s1843_s20  ;;  %s38_s22 = ssub.s32 %s1847_s21, %s2001_s29 }
  0x26   : > { %p48_p6 = scmp.ne.s32.totalorder %s1843_s20, %s1839_s19  ;;  %p39_p7 = scmp.eq.s32.totalorder %s38_s22, 0 }
  0x27   : > { %s476_s16 = sshll.u32 %s2170_s13, 4  ;;  %p49_p8 = scmp.eq.s32.totalorder %s1847_s21, 0  ;;  %s477_s16 = int_to_ptr.hbm [resolvable:$true] %s476_s16 }
  0x28   : > { %1508 = dma.hbm_to_vmem [thread:$0]  (!%p1976_p5), %s477_s16, 1024, %s479_s23, [#allocation12], %s1851_s15, %s1851_s15, %s1852_s12  }
  0x29   : > { %p54_p9 = scmp.ne.s32.totalorder %s1839_s19, %s1835_s18  ;;  %p372_p10 = scmp.eq.s32.totalorder %s1960_s25, 2 }
  0x2a   : > { %s2013_s7 = scalar_select %p39_p7, %s1843_s20, %s41_s30  }
  0x2b   : > { %p2017_p11 = por %p55_p1, %p54_p9  ;;  %p2021_p12 = por %p372_p10, %p48_p6 }
  0x2c   : > { %p378_p13 = scmp.eq.s32.totalorder %s1245_s27, 2  ;;  %p50_p0 = por %p49_p8, %p48_p6 }
  0x2d   : > { %s495_s15 = sand.u32 1, %s1843_s20   ;;  %p1522_p4 = scmp.lt.s32.totalorder %s1847_s21, 3 }
  0x2e   : > { %p2026_p2 = por %p378_p13, %p54_p9  ;;  %s1253_s14 = sshll.u32 %s495_s15, 3 }
  0x2f   : > { %s1254_s24 = sshll.u32 %s1847_s21, 3  ;;  %s499_s30 = scalar_lea.vmem [#allocation2], %s1253_s14 }
  0x30   : > { %s503_s11 = scalar_lea.hbm %s2138_s0, %s1254_s24  ;;  %s507_s22 = sshll.u32 %s499_s30, 4  ;;  %s508_s22 = int_to_ptr.vmem [resolvable:$true] %s507_s22 }
  0x31   : > { %s505_s23 = sshll.u32 %s503_s11, 4  ;;  %p2035_p5 = pnand %p1522_p4, %p50_p0  ;;  %s506_s23 = int_to_ptr.hbm [resolvable:$true] %s505_s23 }
  0x32   : > { %s496_s2 = scalar_lea.sflag [#allocation3], %s495_s15  ;;  %s1739_s8 = sshra.s32 %s506_s23, 4  ;;  %s1740_s8 = int_to_ptr.hbm [resolvable:$true] %s1739_s8 }
  0x33   : > { %s1741_s13 = scalar_lea.hbm %s1740_s8, 8  ;;  %p1743_p7 = pneg %p2035_p5 }
  0x34   : > { %p1742_p6 = scmp.ne.s32.totalorder %s1740_s8, %s1741_s13  ;;  %s1746_s14 = scalar_lea.hbm %s2138_s0, 24 }
  0x35   : > { %p1747_p10 = scmp.lt.s32.totalorder %s1740_s8, %s2138_s0  ;;  %p1748_p13 = scmp.lt.s32.totalorder %s1746_s14, %s1741_s13 }
  0x36   : > { %p1744_p8 = pnand %p1743_p7, %p1742_p6 }
  0x37   : > { %p1749_p0 = por %p1748_p13, %p1747_p10 }
  0x38   : > { %p1745_p9 = pneg %p1744_p8 }
  0x3a   : > { %p1750_p4 = pnand %p1749_p0, %p1745_p9 }
  0x3c   : > { %1753 = shalt.err (!%p1750_p4)
}
  0x3d   : > { %1512 = dma.hbm_to_vmem [thread:$0]  (!%p2035_p5), %s506_s23, 128, %s508_s22, %s496_s2  }
  0x3e   : > { %516 = sbr.rel (%p1965_p3) target bundleno = 878 (0x36e), region = 80  ;;  %s2052_s15 = sand.u32 (!%p1965_p3), 1, %s1839_s19  }
  0x3f   : > { %s1256_s30 = sshll.u32 (!%p1965_p3), %s2052_s15, 3  ;;  %s519_s24 = scalar_lea.sflag (!%p1965_p3), [#allocation3], %s2052_s15 }
  0x40   : > { %s2058_s8 = scalar_lea.vmem (!%p1965_p3), [#allocation2], %s1256_s30 }
  0x43   : > { %1814 = dma.done.wait (%p2017_p11), %s519_s24, 128  }
  0x44   : > { %1816 = vsyncadd (%p2017_p11), %s519_s24, 4294967168 }
  0x45   : > { %1818 = dma.done.wait (%p55_p1), [#allocation6], 2048  }
  0x46   : > { %1820 = vsyncadd (%p55_p1), [#allocation6], 4294965248 }
  0x47   : > { %1822 = dma.done.wait (%p55_p1), [#allocation9], 2048  }
  0x48   : > { %1824 = vsyncadd (%p55_p1), [#allocation9], 4294965248 }
  0x49   : > { %1826 = dma.done.wait (%p55_p1), [#allocation12], 1024  }
  0x4a   : > { %1828 = vsyncadd (%p55_p1), [#allocation12], 4294966272  ;;  %v1444_v0 = vld [vmem:[#allocation7 + $0x38] sm:$0xff]  ;;  %v1443_v2 = vld [vmem:[#allocation7 + $0x30] sm:$0xff]  ;;  %s2175_s13 = sld [smem:[#allocation23_spill]]  ;;  %s1426_s22 = sshll.u32 %s1960_s25, 3 }
  0x4b   : > { %v1436_v1 = vld [vmem:[#allocation5 + $0x38] sm:$0xff]  ;;  %746 = vmatpush.bf16.msra.mxu1 %v1444_v0  ;;  %v1435_v3 = vld [vmem:[#allocation5 + $0x30] sm:$0xff]  ;;  %v1442_v4 = vld [vmem:[#allocation7 + $0x28] sm:$0xff]  ;;  %s2176_s23 = sld [smem:[#allocation24_spill]]  ;;  %s594_s2 = scalar_lea.vmem [#allocation13], %s1256_s30 }
  0x4c   : > { %665 = vmatpush.bf16.msra.mxu0 %v1436_v1  ;;  %v1434_v5 = vld [vmem:[#allocation5 + $0x28] sm:$0xff]  ;;  %v1441_v6 = vld [vmem:[#allocation7 + $0x20] sm:$0xff]  ;;  %v1440_v8 = vld [vmem:[#allocation7 + $0x18] sm:$0xff]  ;;  %s2177_s14 = sld [smem:[#allocation27_spill]]  ;;  %s1112_s17 = scalar_lea.sflag [#allocation4], %s2052_s15 }
  0x4d   : > { %v1433_v7 = vld [vmem:[#allocation5 + $0x20] sm:$0xff]  ;;  %v1432_v9 = vld [vmem:[#allocation5 + $0x18] sm:$0xff]  ;;  %v1439_v10 = vld [vmem:[#allocation7 + $0x10] sm:$0xff] }
  0x4e   : > { %v1431_v11 = vld [vmem:[#allocation5 + $0x10] sm:$0xff]  ;;  %v1438_v12 = vld [vmem:[#allocation7 + $0x8] sm:$0xff]  ;;  %v1437_v14 = vld [vmem:[#allocation7] sm:$0xff] }
  0x4f   : > { %747 = vmatpush.bf16.msra.mxu1 %v1443_v2  ;;  %v1430_v13 = vld [vmem:[#allocation5 + $0x8] sm:$0xff]  ;;  %v595_v15 = vld [vmem:[%s2058_s8] sm:$0xff]  ;;  %v1429_v16 = vld [vmem:[#allocation5] sm:$0xff]  ;;  %s2178_s8 = sld [smem:[#allocation26_spill]] }
  0x50   : > { %666 = vmatpush.bf16.msra.mxu0 %v1435_v3  ;;  %v596_v17 = vpack.c.bf16 %v595_v15, %v595_v15  ;;  %v1568_v18 = vld [vmem:[%s2142_s4] ss:$0 sm:$0xff]  ;;  %v1452_v41 = vld [vmem:[#allocation8 + $0x38] sm:$0xff]  ;;  %v1450_v45 = vld [vmem:[#allocation8 + $0x28] sm:$0xff] }
  0x51   : > { %v1569_v29 = vld [vmem:[%s2141_s3] ss:$0 sm:$0xff]  ;;  %v1460_v42 = vld [vmem:[#allocation10 + $0x38] sm:$0xff]  ;;  %881 = vmatpush.bf16.msra.mxu2 %v1452_v41  ;;  %v1458_v46 = vld [vmem:[#allocation10 + $0x28] sm:$0xff] }
  0x52   : > { %962 = vmatpush.bf16.msra.mxu3 %v1460_v42  ;;  %v1451_v43 = vld [vmem:[#allocation8 + $0x30] sm:$0xff]  ;;  %v1449_v47 = vld [vmem:[#allocation8 + $0x20] sm:$0xff]  ;;  %v1448_v49 = vld [vmem:[#allocation8 + $0x18] sm:$0xff]  ;;  %s1122_s16 = scalar_lea.hbm %s2177_s14, %s1426_s22  ;;  %s1789_s28 = scalar_lea.hbm %s2177_s14, 24 }
  0x53   : > { %748 = vmatpush.bf16.msra.mxu1 %v1442_v4  ;;  %v1459_v44 = vld [vmem:[#allocation10 + $0x30] sm:$0xff]  ;;  %v1457_v48 = vld [vmem:[#allocation10 + $0x20] sm:$0xff]  ;;  %v1456_v50 = vld [vmem:[#allocation10 + $0x18] sm:$0xff]  ;;  %s1126_s26 = sshll.u32 %s1122_s16, 4  ;;  %s1127_s26 = int_to_ptr.hbm [resolvable:$true] %s1126_s26 }
  0x54   : > { %667 = vmatpush.bf16.msra.mxu0 %v1434_v5  ;;  %v1447_v51 = vld [vmem:[#allocation8 + $0x10] sm:$0xff]  ;;  %v1446_v54 = vld [vmem:[#allocation8 + $0x8] sm:$0xff]  ;;  %v1445_v56 = vld [vmem:[#allocation8] sm:$0xff]  ;;  %s1783_s25 = sshra.s32 %s1127_s26, 4  ;;  %s1784_s25 = int_to_ptr.hbm [resolvable:$true] %s1783_s25 }
  0x55   : > { %882 = vmatpush.bf16.msra.mxu2 %v1451_v43  ;;  %v1455_v52 = vld [vmem:[#allocation10 + $0x10] sm:$0xff]  ;;  %v1454_v55 = vld [vmem:[#allocation10 + $0x8] sm:$0xff]  ;;  %v1453_v57 = vld [vmem:[#allocation10] sm:$0xff]  ;;  %p1790_p5 = scmp.lt.s32.totalorder %s1784_s25, %s2177_s14 }
  0x56   : > { %963 = vmatpush.bf16.msra.mxu3 %v1459_v44  ;;  %v1573_v15 = vld [vmem:[%s2148_s10] ss:$0 sm:$0xff]  ;;  %v1465_v41 = vld [vmem:[#allocation11 + $0x20] sm:$0xff]  ;;  %v1464_v42 = vld [vmem:[#allocation11 + $0x18] sm:$0xff] }
  0x57   : > { %749 = vmatpush.bf16.msra.mxu1 %v1441_v6  ;;  %v1463_v43 = vld [vmem:[#allocation11 + $0x10] sm:$0xff] }
  0x58   : > { %668 = vmatpush.bf16.msra.mxu0 %v1433_v7 }
  0x59   : > { %883 = vmatpush.bf16.msra.mxu2 %v1450_v45  ;;  %v1462_v45 = vld [vmem:[#allocation11 + $0x8] sm:$0xff] }
  0x5a   : > { %964 = vmatpush.bf16.msra.mxu3 %v1458_v46  ;;  %v1461_v46 = vld [vmem:[#allocation11] sm:$0xff] }
  0x5b   : > { %750 = vmatpush.bf16.msra.mxu1 %v1440_v8  ;;  %v1570_v8 = vld [vmem:[%s2143_s5] ss:$0 sm:$0xff] }
  0x5c   : > { %669 = vmatpush.bf16.msra.mxu0 %v1432_v9 }
  0x5d   : > { %884 = vmatpush.bf16.msra.mxu2 %v1449_v47 }
  0x5e   : > { %965 = vmatpush.bf16.msra.mxu3 %v1457_v48 }
  0x5f   : > { %751 = vmatpush.bf16.msra.mxu1 %v1439_v10 }
  0x60   : > { %670 = vmatpush.bf16.msra.mxu0 %v1431_v11  ;;  %v1571_v11 = vld [vmem:[%s2144_s6] ss:$0 sm:$0xff] }
  0x61   : > { %885 = vmatpush.bf16.msra.mxu2 %v1448_v49 }
  0x62   : > { %966 = vmatpush.bf16.msra.mxu3 %v1456_v50 }
  0x63   : > { %752 = vmatpush.bf16.msra.mxu1 %v1438_v12 }
  0x64   : > { %671 = vmatpush.bf16.msra.mxu0 %v1430_v13 }
  0x65   : > { %886 = vmatpush.bf16.msra.mxu2 %v1447_v51 }
  0x66   : > { %967 = vmatpush.bf16.msra.mxu3 %v1455_v52 }
  0x67   : > { %753 = vmatpush.bf16.msra.mxu1 %v1437_v14 }
  0x68   : > { %672 = vmatpush.bf16.msra.mxu0 %v1429_v16 }
  0x69   : > { %887 = vmatpush.bf16.msra.mxu2 %v1446_v54 }
  0x6a   : > { %754 = vmatmul.bf16.vlgmr.msra.gmra.mxu1 %v596_v17  ;;  %968 = vmatpush.bf16.msra.mxu3 %v1454_v55 }
  0x6b   : > { %673 = vmatmul.bf16.vlgmr.msra.gmra.mxu0 %v596_v17 }
  0x6d   : > { %888 = vmatpush.bf16.msra.mxu2 %v1445_v56 }
  0x6e   : > { %969 = vmatpush.bf16.msra.mxu3 %v1453_v57 }
  0xe7   : > { %v755_v19 = vpop.f32.mrf.mxu1 }
  0xe8   : > { %v756_v20 = vadd.f32 %v1568_v18, %v755_v19  ;;  %v674_v21 = vpop.f32.mrf.mxu0 }
  0xe9   : > { %v675_v34 = vadd.f32 %v1569_v29, %v674_v21 }
  0xea   : > { %v1327_v22 = vmul.f32 -1.442695, %v756_v20 }
  0xec   : > { %1577 = vpow2.f32 %v1327_v22 }
  0xef   : > { %v757_v23 = vpop.f32.mrf.mxu1 }
  0xf0   : > { %v676_v24 = vpop.f32.mrf.mxu0 }
  0xf2   : > { %v1578_v25 = vpop.eup %1577 }
  0xf3   : > { %v762_v26 = vadd.f32 1.0, %v1578_v25 }
  0xf5   : > { %1579 = vrcp.f32 %v762_v26  ;;  %v774_v31 = vand.u32 2147483648, %v762_v26  ;;  %v772_v33 = vand.u32 2147483647, %v762_v26  ;;  %vm768_vm1 = vweird.f32 %v762_v26 }
  0xf7   : > { %v775_v36 = vor.u32 1.1754944e-38, %v774_v31  ;;  %vm773_vm3 = vcmp.eq.f32.partialorder %v772_v33, 8.507059e+37 }
  0xfb   : > { %v1580_v27 = vpop.eup %1579 }
  0xfc   : > { %v764_v28 = vmul.f32 %v1580_v27, %v762_v26  ;;  %vm769_vm0 = vweird.f32 %v1580_v27 }
  0xfd   : > { %vm770_vm2 = vmor %vm768_vm1, %vm769_vm0 }
  0xfe   : > { %v765_v30 = vsub.f32 1.0, %v764_v28  ;;  %v1572_v28 = vld [vmem:[%s2147_s9] ss:$0 sm:$0xff] }
 0x100   : > { %v766_v32 = vmul.f32 %v1580_v27, %v765_v30 }
 0x102   : > { %v767_v35 = vadd.f32 %v1580_v27, %v766_v32 }
 0x104   : > { %v771_v37 = vsel %vm770_vm2, %v1580_v27, %v767_v35 }
 0x105   : > { %v776_v38 = vsel %vm773_vm3, %v775_v36, %v771_v37 }
 0x106   : > { %v778_v39 = vmul.f32 %v776_v38, %v675_v34  ;;  %v1468_v38 = vld [vmem:[#allocation11 + $0x38] sm:$0xff] }
 0x107   : > { %1097 = vmatpush.bf16.msrb.mxu0 %v1468_v38 }
 0x108   : > { %779 = vadd.xlane.f32.xlu0 %v778_v39  ;;  %v782_v40 = vmul.f32 %v778_v39, %v778_v39 }
 0x110   : > { %783 = vadd.xlane.f32.xlu0 %v782_v40  ;;  %v1466_v40 = vld [vmem:[#allocation11 + $0x28] sm:$0xff] }
 0x17b   : > { %v780_v53 = vpop.xlane.xlu0 %779 }
 0x17c   : > { %v781_v58 = vmul.f32 0.03125, %v780_v53 }
 0x17e   : > { %v786_v60 = vmul.f32 %v781_v58, %v781_v58  ;;  %v789_v7 = vsub.f32 %v778_v39, %v781_v58  ;;  %v1467_v39 = vld [vmem:[#allocation11 + $0x30] sm:$0xff] }
 0x17f   : > { %1098 = vmatpush.bf16.msrb.mxu0 %v1467_v39 }
 0x183   : > { %v784_v59 = vpop.xlane.xlu0 %783  ;;  %1099 = vmatpush.bf16.msrb.mxu0 %v1466_v40 }
 0x184   : > { %v785_v61 = vmul.f32 0.03125, %v784_v59 }
 0x186   : > { %v787_v62 = vsub.f32 %v785_v61, %v786_v60  ;;  %v1574_v61 = vld [vmem:[%s2175_s13] ss:$0 sm:$0xff]  ;;  %s1124_s13 = sshll.u32 %s594_s2, 4  ;;  %s1125_s13 = int_to_ptr.vmem [resolvable:$true] %s1124_s13 }
 0x187   : > { %1100 = vmatpush.bf16.msrb.mxu0 %v1465_v41 }
 0x188   : > { %v788_v63 = vmax.f32 %v787_v62, 0.0 }
 0x18a   : > { %v790_v0 = vadd.f32 1e-05, %v788_v63 }
 0x18b   : > { %1101 = vmatpush.bf16.msrb.mxu0 %v1464_v42 }
 0x18c   : > { %1581 = vrsqrt.f32 %v790_v0  ;;  %vm797_vm5 = vweird.f32 %v790_v0 }
 0x18f   : > { %1102 = vmatpush.bf16.msrb.mxu0 %v1463_v43 }
 0x192   : > { %v1582_v1 = vpop.eup %1581 }
 0x193   : > { %v792_v2 = vmul.f32 %v1582_v1, %v790_v0  ;;  %vm798_vm4 = vweird.f32 %v1582_v1  ;;  %1103 = vmatpush.bf16.msrb.mxu0 %v1462_v45  ;;  %v1575_v0 = vld [vmem:[%s2176_s23] ss:$0 sm:$0xff]  ;;  %s1785_s23 = scalar_lea.hbm %s1784_s25, 8 }
 0x194   : > { %vm799_vm6 = vmor %vm797_vm5, %vm798_vm4  ;;  %p1786_p1 = scmp.ne.s32.totalorder %s1784_s25, %s1785_s23  ;;  %p1791_p6 = scmp.lt.s32.totalorder %s1789_s28, %s1785_s23 }
 0x195   : > { %v793_v3 = vmul.f32 %v1582_v1, %v792_v2 }
 0x196   : > { %p1787_p3 = pnand %p1786_p1, %p2021_p12  ;;  %p1792_p7 = por %p1791_p6, %p1790_p5 }
 0x197   : > { %v794_v4 = vmul.f32 0.5, %v793_v3  ;;  %1104 = vmatpush.bf16.msrb.mxu0 %v1461_v46 }
 0x198   : > { %p1788_p11 = pneg %p1787_p3 }
 0x199   : > { %v795_v5 = vsub.f32 1.5, %v794_v4  ;;  %v1576_v4 = vld [vmem:[%s2178_s8] ss:$0 sm:$0xff] }
 0x19a   : > { %p1793_p8 = pnand %p1792_p7, %p1788_p11 }
 0x19b   : > { %v796_v6 = vmul.f32 %v1582_v1, %v795_v5 }
 0x19d   : > { %v800_v9 = vsel %vm799_vm6, %v1582_v1, %v796_v6 }
 0x19e   : > { %v801_v10 = vmul.f32 %v800_v9, %v789_v7 }
 0x1a0   : > { %v806_v12 = vmul.f32 %v1570_v8, %v801_v10 }
 0x1a2   : > { %v811_v13 = vadd.f32 %v1571_v11, %v806_v12 }
 0x1a4   : > { %v812_v14 = vpack.c.bf16 %v811_v13, %v811_v13 }
 0x1a6   : > { %889 = vmatmul.bf16.vlgmr.msra.gmra.mxu2 %v812_v14  ;;  %970 = vmatmul.bf16.vlgmr.msra.gmra.mxu3 %v812_v14 }
 0x229   : > { %v890_v16 = vpop.f32.mrf.mxu2  ;;  %v971_v17 = vpop.f32.mrf.mxu3 }
 0x22a   : > { %v972_v18 = vadd.f32 %v1573_v15, %v971_v17  ;;  %v891_v33 = vadd.f32 %v1572_v28, %v890_v16 }
 0x22c   : > { %v1392_v19 = vmul.f32 -1.442695, %v972_v18 }
 0x22e   : > { %1583 = vpow2.f32 %v1392_v19 }
 0x231   : > { %v892_v20 = vpop.f32.mrf.mxu2  ;;  %v973_v21 = vpop.f32.mrf.mxu3 }
 0x234   : > { %v1584_v22 = vpop.eup %1583 }
 0x235   : > { %v978_v23 = vadd.f32 1.0, %v1584_v22 }
 0x237   : > { %1585 = vrcp.f32 %v978_v23  ;;  %v990_v27 = vand.u32 2147483648, %v978_v23  ;;  %v988_v30 = vand.u32 2147483647, %v978_v23  ;;  %vm984_vm8 = vweird.f32 %v978_v23 }
 0x239   : > { %v991_v32 = vor.u32 1.1754944e-38, %v990_v27  ;;  %vm989_vm10 = vcmp.eq.f32.partialorder %v988_v30, 8.507059e+37 }
 0x23d   : > { %v1586_v24 = vpop.eup %1585 }
 0x23e   : > { %v980_v25 = vmul.f32 %v1586_v24, %v978_v23  ;;  %vm985_vm7 = vweird.f32 %v1586_v24 }
 0x23f   : > { %vm986_vm9 = vmor %vm984_vm8, %vm985_vm7 }
 0x240   : > { %v981_v26 = vsub.f32 1.0, %v980_v25 }
 0x242   : > { %v982_v29 = vmul.f32 %v1586_v24, %v981_v26 }
 0x244   : > { %v983_v31 = vadd.f32 %v1586_v24, %v982_v29 }
 0x246   : > { %v987_v34 = vsel %vm986_vm9, %v1586_v24, %v983_v31 }
 0x247   : > { %v992_v35 = vsel %vm989_vm10, %v991_v32, %v987_v34 }
 0x248   : > { %v994_v36 = vmul.f32 %v992_v35, %v891_v33 }
 0x24a   : > { %995 = vadd.xlane.f32.xlu1 %v994_v36  ;;  %v998_v37 = vmul.f32 %v994_v36, %v994_v36 }
 0x252   : > { %999 = vadd.xlane.f32.xlu1 %v998_v37 }
 0x2bd   : > { %v996_v44 = vpop.xlane.xlu1 %995 }
 0x2be   : > { %v997_v47 = vmul.f32 0.03125, %v996_v44 }
 0x2c0   : > { %v1002_v49 = vmul.f32 %v997_v47, %v997_v47  ;;  %v1005_v60 = vsub.f32 %v994_v36, %v997_v47 }
 0x2c5   : > { %v1000_v48 = vpop.xlane.xlu1 %999 }
 0x2c6   : > { %v1001_v50 = vmul.f32 0.03125, %v1000_v48 }
 0x2c8   : > { %v1003_v51 = vsub.f32 %v1001_v50, %v1002_v49 }
 0x2ca   : > { %v1004_v52 = vmax.f32 %v1003_v51, 0.0 }
 0x2cc   : > { %v1006_v53 = vadd.f32 1e-05, %v1004_v52 }
 0x2ce   : > { %1587 = vrsqrt.f32 %v1006_v53  ;;  %vm1013_vm12 = vweird.f32 %v1006_v53 }
 0x2d4   : > { %v1588_v54 = vpop.eup %1587 }
 0x2d5   : > { %v1008_v55 = vmul.f32 %v1588_v54, %v1006_v53  ;;  %vm1014_vm11 = vweird.f32 %v1588_v54 }
 0x2d6   : > { %vm1015_vm13 = vmor %vm1013_vm12, %vm1014_vm11 }
 0x2d7   : > { %v1009_v56 = vmul.f32 %v1588_v54, %v1008_v55 }
 0x2d9   : > { %v1010_v57 = vmul.f32 0.5, %v1009_v56 }
 0x2db   : > { %v1011_v58 = vsub.f32 1.5, %v1010_v57 }
 0x2dd   : > { %v1012_v59 = vmul.f32 %v1588_v54, %v1011_v58 }
 0x2df   : > { %v1016_v62 = vsel %vm1015_vm13, %v1588_v54, %v1012_v59 }
 0x2e0   : > { %v1017_v63 = vmul.f32 %v1016_v62, %v1005_v60 }
 0x2e2   : > { %v1022_v1 = vmul.f32 %v1574_v61, %v1017_v63 }
 0x2e4   : > { %v1027_v2 = vadd.f32 %v1575_v0, %v1022_v1 }
 0x2e6   : > { %v1028_v3 = vpack.c.bf16 %v1027_v2, %v1027_v2 }
 0x2e8   : > { %1105 = vmatmul.bf16.vlgmr.msrb.gmra.mxu0 %v1028_v3 }
 0x365   : > { %v1106_v5 = vpop.f32.mrf.mxu0 }
 0x366   : > { %v1107_v6 = vadd.f32 %v1576_v4, %v1106_v5 }
 0x368   : > { %1110 = vst [vmem:[%s594_s2] sm:$0xff] %v1107_v6 }
 0x369   : > { %1796 = shalt.err (!%p1793_p8)
}
 0x36a   : > { %1491 = dma.vmem_to_hbm [thread:$0]  (%p2021_p12), %s1125_s13, 128, %s1127_s26, %s1112_s17  }
 0x36d   : > { %v1108_v7 = vpop.f32.mrf.mxu0 }
 0x36e PF: > { %p1528_p9 = scmp.ge.s32.totalorder %s1847_s21, 2  ;;  %s1138_s15 = sand.u32 1, %s1835_s18  }
 0x36f   : > { %s1139_s16 = scalar_lea.sflag [#allocation4], %s1138_s15 }
 0x370   : > { %p1514_p10 = pnand %p1528_p9, %p2026_p2 }
 0x372   : > { %p1515_p13 = pneg %p1514_p10 }
 0x374   : > { %1830 = dma.done.wait (%p1515_p13), %s1139_s16, 128  }
 0x375   : > { %1832 = vsyncadd (%p1515_p13), %s1139_s16, 4294967168  ;;  %p31_p0 = scmp.ge.s32.totalorder %s2001_s29, 5   ;;  %s2179_s18 = smov %s1839_s19 }
 0x376   : > { %s2180_s19 = smov %s1843_s20  ;;  %s2181_s20 = smov %s2013_s7 }
 0x377   : > { %s2182_s21 = smov %s2001_s29  ;;  %33 = sbr.rel (!%p31_p0) target bundleno = 18 (0x12), region = 145 }
 0x37c   :  { %1145 = vsyncpa [#allocation3], 1 }
 0x37d   :  { %1147 = vsyncpa [#allocation3 + $0x1], 1 }
 0x37e   :  { %1148 = vsyncpa [#allocation6], 1 }
 0x37f   :  { %1149 = vsyncpa [#allocation9], 1 }
 0x380   :  { %1150 = vsyncpa [#allocation12], 1 }
 0x381   :  { %1151 = vsyncpa [#allocation4], 1 }
 0x382   :  { %1153 = vsyncpa [#allocation4 + $0x1], 1 }

</bundles_post_ra>
